<compile_context>
chip_gen: v7x
topology: tpu7x:2x2x1
jax: 0.10.0
libtpu: 0.0.40
codegen_flags: <defaults>
</compile_context>

<pallas_src>
import functools

import jax
import jax.numpy as jnp
from jax.experimental import pallas as pl
from jax.experimental.pallas import tpu as pltpu


def _round_up(x, m):
    return ((x + m - 1) // m) * m


def _pad_nodes(n):
    # Pad UP to a 512 multiple — never shrink the reduction tile below 512.
    return _round_up(max(n, 512), 512)


def _tiles_from_npad(n_pad):
    # Reduction tile (adj columns streamed per step): largest that divides n_pad.
    t_k = max(t for t in (2048, 1024, 512) if n_pad % t == 0)
    # Row tile: keep the "parallel" tile count even (>=2) so both v7x TCs get work.
    t_i = 512 if (n_pad // 512) % 2 == 0 else 256
    return t_i, t_k


def _feature_tile(f_pad):
    return max(t for t in (1024, 512, 256, 128) if f_pad % t == 0)


# --------------------------------- kernels ----------------------------------


def degree_kernel(adjT_ref, dis_ref):
    """dis[t] = rsqrt( rowsum(adjT)[t] + 1 ) = rsqrt( colsum(adj)[t] + 1 )."""
    k = pl.program_id(1)

    @pl.when(k == 0)
    def _():
        dis_ref[...] = jnp.zeros_like(dis_ref)

    dis_ref[...] += jnp.sum(adjT_ref[...], axis=1, keepdims=True)

    @pl.when(k == pl.num_programs(1) - 1)
    def _():
        dis_ref[...] = jax.lax.rsqrt(dis_ref[...] + 1.0)


def project_kernel(x_ref, w1_ref, dis_ref, y_ref, acc_ref):
    """y1 = dis * (X @ W1), f32 accumulation over feature tiles."""
    f = pl.program_id(1)

    @pl.when(f == 0)
    def _():
        acc_ref[...] = jnp.zeros_like(acc_ref)

    acc_ref[...] += jnp.dot(x_ref[...], w1_ref[...],
                            preferred_element_type=jnp.float32)

    @pl.when(f == pl.num_programs(1) - 1)
    def _():
        y_ref[...] = (dis_ref[...] * acc_ref[...]).astype(y_ref.dtype)


def agg1_kernel(adjT_ref, y1_ref, dis_ref, b1_ref, w2_ref, y2_ref, acc_ref,
                *, t_i, t_k):
    """Layer-1 aggregation fused with the layer-2 projection:
         h1 = relu( dis * (adjT @ y1 + y1_self) + b1 )
         y2 = dis * (h1 @ W2)                       (y1 is VMEM-resident)
    """
    i = pl.program_id(0)
    k = pl.program_id(1)

    @pl.when(k == 0)
    def _():
        acc_ref[...] = jnp.zeros_like(acc_ref)

    ysrc = y1_ref[pl.ds(pl.multiple_of(k * t_k, t_k), t_k), :]
    acc_ref[...] += jnp.dot(adjT_ref[...], ysrc,
                            preferred_element_type=jnp.float32)

    @pl.when(k == pl.num_programs(1) - 1)
    def _():
        yself = y1_ref[pl.ds(pl.multiple_of(i * t_i, t_i), t_i), :]
        dis = dis_ref[...]
        h1 = dis * (acc_ref[...] + yself.astype(jnp.float32)) + b1_ref[...]
        h1 = jnp.maximum(h1, 0.0)                       # eval-mode dropout = identity
        y2 = dis * jnp.dot(h1.astype(w2_ref.dtype), w2_ref[...],
                           preferred_element_type=jnp.float32)
        y2_ref[...] = y2.astype(y2_ref.dtype)


def agg2_kernel(adjT_ref, y2_ref, dis_ref, b2_ref, out_ref, acc_ref, *, t_i, t_k):
    """Layer-2 aggregation + temperature-scaled log-softmax:
         h2  = dis * (adjT @ y2 + y2_self) + b2      (y2 is VMEM-resident)
         out = log_softmax(h2 / 0.2, axis=1)
    """
    i = pl.program_id(0)
    k = pl.program_id(1)

    @pl.when(k == 0)
    def _():
        acc_ref[...] = jnp.zeros_like(acc_ref)

    ysrc = y2_ref[pl.ds(pl.multiple_of(k * t_k, t_k), t_k), :]
    acc_ref[...] += jnp.dot(adjT_ref[...], ysrc,
                            preferred_element_type=jnp.float32)

    @pl.when(k == pl.num_programs(1) - 1)
    def _():
        yself = y2_ref[pl.ds(pl.multiple_of(i * t_i, t_i), t_i), :]
        h2 = dis_ref[...] * (acc_ref[...] + yself.astype(jnp.float32)) + b2_ref[...]
        z = h2 * (1.0 / 0.2)
        z_max = jnp.max(z, axis=1, keepdims=True)
        z_sh = z - z_max
        lse = jnp.log(jnp.sum(jnp.exp(z_sh), axis=1, keepdims=True))
        out_ref[...] = (z_sh - lse).astype(out_ref.dtype)


# --------------------------------- wrappers ----------------------------------

# Large tiles + resident y blocks: raise the scoped-VMEM limit above the v5e
# 16 MiB default while staying below v7x's 64 MiB physical per-TC VMEM.
_PAR_ARB = pltpu.CompilerParams(
    dimension_semantics=("parallel", "arbitrary"),
    vmem_limit_bytes=48 * 1024 * 1024)


@jax.jit
def cog_prepare(adj):
    """Graph-static preprocessing — call ONCE per graph and cache the result.

    Returns (adjT_p, dis):
      adjT_p : (n_pad, n_pad) bf16, transposed + zero-padded adjacency
               (rows = target nodes, canonical MXU contraction orientation)
      dis    : (n_pad, 1) f32, rsqrt(column-degree(adj) + 1), computed from f32 adj
    """
    f32 = jnp.float32
    N = adj.shape[0]
    n_pad = _pad_nodes(N)
    t_i, t_k = _tiles_from_npad(n_pad)

    adjT32 = jnp.pad(adj.astype(f32).T, ((0, n_pad - N), (0, n_pad - N)))

    dis = pl.pallas_call(
        degree_kernel,
        out_shape=jax.ShapeDtypeStruct((n_pad, 1), f32),
        grid=(n_pad // t_i, n_pad // t_k),
        in_specs=[pl.BlockSpec((t_i, t_k), lambda i, k: (i, k))],
        out_specs=pl.BlockSpec((t_i, 1), lambda i, k: (i, 0)),
        compiler_params=_PAR_ARB,
    )(adjT32)

    return adjT32.astype(jnp.bfloat16), dis


@jax.jit
def cog_apply(x, adjT_p, dis, w1, b1, w2, b2):
    """CoG.forward with cached (adjT_p, dis) -> log-softmax scores, shape (N, nclass)."""
    f32, bf16 = jnp.float32, jnp.bfloat16
    N, F = x.shape
    n_pad = adjT_p.shape[0]
    t_i, t_k = _tiles_from_npad(n_pad)
    n_i, n_k = n_pad // t_i, n_pad // t_k

    nhid = w1.shape[1]
    nclass = w2.shape[1]
    HP = _round_up(nhid, 128)       # lane-dense hidden dim
    CP = _round_up(nclass, 128)     # lane-dense class dim
    FP = _round_up(F, 128)
    t_f = _feature_tile(FP)
    n_f = FP // t_f

    x_p = jnp.pad(x.astype(bf16), ((0, n_pad - N), (0, FP - F)))
    w1_p = jnp.pad(w1.astype(bf16), ((0, FP - F), (0, HP - nhid)))
    b1_p = jnp.pad(b1.reshape(1, -1).astype(f32), ((0, 0), (0, HP - nhid)))
    w2_p = jnp.pad(w2.astype(bf16), ((0, HP - nhid), (0, CP - nclass)))
    # Padded classes get a finite -1e9 bias so exp() -> 0 without risking -inf.
    b2_p = jnp.pad(b2.reshape(1, -1).astype(f32), ((0, 0), (0, CP - nclass)),
                   constant_values=-1e9)

    # --- y1 = dis * (X @ W1) --------------------------------------------------
    y1 = pl.pallas_call(
        project_kernel,
        out_shape=jax.ShapeDtypeStruct((n_pad, HP), bf16),
        grid=(n_i, n_f),
        in_specs=[pl.BlockSpec((t_i, t_f), lambda i, f: (i, f)),
                  pl.BlockSpec((t_f, HP), lambda i, f: (f, 0)),
                  pl.BlockSpec((t_i, 1), lambda i, f: (i, 0))],
        out_specs=pl.BlockSpec((t_i, HP), lambda i, f: (i, 0)),
        scratch_shapes=[pltpu.VMEM((t_i, HP), f32)],
        compiler_params=_PAR_ARB,
    )(x_p, w1_p, dis)

    # --- layer-1 aggregate (+relu) fused with layer-2 projection --------------
    # y1 is VMEM-resident (constant full-extent block) so it is DMA'd once, not
    # re-streamed per output row tile.
    # (For graphs where n_pad*HP*2 bytes would not fit VMEM, fall back to a
    #  per-k streamed (t_k, HP) BlockSpec — not needed before the dense N x N
    #  adjacency itself becomes the limiting factor.)
    y2 = pl.pallas_call(
        functools.partial(agg1_kernel, t_i=t_i, t_k=t_k),
        out_shape=jax.ShapeDtypeStruct((n_pad, CP), bf16),
        grid=(n_i, n_k),
        in_specs=[pl.BlockSpec((t_i, t_k), lambda i, k: (i, k)),   # adjT[t_blk, s_blk]
                  pl.BlockSpec((n_pad, HP), lambda i, k: (0, 0)),  # y1 (resident)
                  pl.BlockSpec((t_i, 1), lambda i, k: (i, 0)),     # dis (targets)
                  pl.BlockSpec((1, HP), lambda i, k: (0, 0)),      # b1
                  pl.BlockSpec((HP, CP), lambda i, k: (0, 0))],    # W2 (bf16)
        out_specs=pl.BlockSpec((t_i, CP), lambda i, k: (i, 0)),
        scratch_shapes=[pltpu.VMEM((t_i, HP), f32)],
        compiler_params=_PAR_ARB,
    )(adjT_p, y1, dis, b1_p, w2_p)

    # --- layer-2 aggregate + log_softmax(h2 / 0.2) -----------------------------
    out_p = pl.pallas_call(
        functools.partial(agg2_kernel, t_i=t_i, t_k=t_k),
        out_shape=jax.ShapeDtypeStruct((n_pad, CP), f32),
        grid=(n_i, n_k),
        in_specs=[pl.BlockSpec((t_i, t_k), lambda i, k: (i, k)),
                  pl.BlockSpec((n_pad, CP), lambda i, k: (0, 0)),  # y2 (resident)
                  pl.BlockSpec((t_i, 1), lambda i, k: (i, 0)),
                  pl.BlockSpec((1, CP), lambda i, k: (0, 0))],
        out_specs=pl.BlockSpec((t_i, CP), lambda i, k: (i, 0)),
        scratch_shapes=[pltpu.VMEM((t_i, CP), f32)],
        compiler_params=_PAR_ARB,
    )(adjT_p, y2, dis, b2_p)

    # s_pred[:self.n_real] — n_real == N here (x_new == x); strip row/class padding.
    return out_p[:N, :nclass]


def cog_forward(x, adj, w1, b1, w2, b2):
    """One-shot CoG.forward(x, adj). For repeated calls on the same graph, call
    cog_prepare(adj) once and reuse (adjT_p, dis) with cog_apply."""
    adjT_p, dis = cog_prepare(adj)
    return cog_apply(x, adjT_p, dis, w1, b1, w2, b2)


def _reference(x, adj, w1, b1, w2, b2):
    """Pure-JAX f32 reference of the same math for the correctness check."""
    N = x.shape[0]
    a_hat = adj + jnp.eye(N, dtype=adj.dtype)
    deg = jnp.sum(a_hat, axis=0)                    # column degrees (gcn_norm)
    dis = deg ** -0.5
    norm_adj = (a_hat.T * dis[:, None]) * dis[None, :]
    h1 = jax.nn.relu(norm_adj @ (x @ w1) + b1)
    h2 = norm_adj @ (h1 @ w2) + b2
    return jax.nn.log_softmax(h2 / 0.2, axis=1)


if __name__ == "__main__":
    key = jax.random.PRNGKey(0)
    k_x, k_a, k_w1, k_b1, k_w2, k_b2 = jax.random.split(key, 6)

    # Small shapes consistent with CoG(nfeat, nhid, nclass): model_s = GCN(nfeat, nhid, nclass)
    N, nfeat, nhid, nclass = 16, 32, 32, 8

    x = jax.random.normal(k_x, (N, nfeat), dtype=jnp.float32)

    # Symmetric dense adjacency with zero diagonal, non-negative weights.
    a_raw = jax.random.uniform(k_a, (N, N), dtype=jnp.float32)
    a_sym = 0.5 * (a_raw + a_raw.T)
    adj = jnp.where(a_sym > 0.6, a_sym, 0.0)
    adj = adj * (1.0 - jnp.eye(N, dtype=jnp.float32))

    # Deterministic GCNConv parameters (Glorot-ish scaling). Biases kept 2D (1, D).
    w1 = jax.random.normal(k_w1, (nfeat, nhid), dtype=jnp.float32) * (2.0 / (nfeat + nhid)) ** 0.5
    b1 = jax.random.normal(k_b1, (1, nhid), dtype=jnp.float32) * 0.01
    w2 = jax.random.normal(k_w2, (nhid, nclass), dtype=jnp.float32) * (2.0 / (nhid + nclass)) ** 0.5
    b2 = jax.random.normal(k_b2, (1, nclass), dtype=jnp.float32) * 0.01

    # Graph-static preprocessing cached once; forward reuses it.
    adjT_p, dis = cog_prepare(adj)
    adjT_p, dis = jax.block_until_ready(adjT_p), jax.block_until_ready(dis)

    out = cog_apply(x, adjT_p, dis, w1, b1, w2, b2)
    out = jax.block_until_ready(out)

    ref = _reference(x, adj, w1, b1, w2, b2)
    assert out.shape == (N, nclass)
    assert bool(jnp.all(jnp.isfinite(out)))
    # bf16 adjacency / streamed features (f32 accumulation, f32 degrees) vs f32 ref.
    assert bool(jnp.allclose(out, ref, atol=3e-2, rtol=3e-2))

    # TODO(synk): knn_fast / MLP_learner / GCL / GAN branches are training-time
    # utilities, not part of CoG.forward, so they are intentionally not kernelized.
    print("KERNEL_OK")
</pallas_src>

<mosaic_0001>
module attributes {stable_mosaic.version = 11 : i64} {
  func.func @degree_kernel(%arg0: i32, %arg1: i32, %arg2: memref<256x512xf32, #tpu.memory_space<vmem>>, %arg3: memref<256x1xf32, #tpu.memory_space<vmem>>) attributes {dimension_semantics = [#tpu.dimension_semantics<parallel>, #tpu.dimension_semantics<arbitrary>], iteration_bounds = array<i64: 2, 1>, scalar_prefetch = 0 : i64, scratch_operands = 0 : i64, tpu.core_type = #tpu.core_type<tc>, window_params = [{transform_indices = @transform_0, window_bounds = array<i64: 256, 512>}, {transform_indices = @transform_1, window_bounds = array<i64: 256, 1>}]} {
    %c0_i32 = arith.constant 0 : i32
    %0 = arith.cmpi eq, %arg1, %c0_i32 : i32
    %1 = arith.extui %0 : i1 to i32
    %c0_i32_0 = arith.constant 0 : i32
    %2 = arith.cmpi ne, %1, %c0_i32_0 : i32
    scf.if %2 {
      %cst_8 = arith.constant 0.000000e+00 : f32
      %12 = vector.broadcast %cst_8 : f32 to vector<256x1xf32>
      %c0_9 = arith.constant 0 : index
      %c0_10 = arith.constant 0 : index
      %13 = vector.load %arg3[%c0_9, %c0_10] : memref<256x1xf32, #tpu.memory_space<vmem>>, vector<256x1xf32>
      tpu.vector_store %arg3[%c0_9, %c0_10], %12 {strides = array<i32>} : memref<256x1xf32, #tpu.memory_space<vmem>>, vector<256x1xf32>,
    } else {
    }
    %c0 = arith.constant 0 : index
    %c0_1 = arith.constant 0 : index
    %3 = vector.load %arg3[%c0, %c0_1] : memref<256x1xf32, #tpu.memory_space<vmem>>, vector<256x1xf32>
    %c0_2 = arith.constant 0 : index
    %c0_3 = arith.constant 0 : index
    %4 = vector.load %arg2[%c0_2, %c0_3] : memref<256x512xf32, #tpu.memory_space<vmem>>, vector<256x512xf32>
    %cst = arith.constant dense<0.000000e+00> : vector<256xf32>
    %5 = vector.multi_reduction <add>, %4, %cst [1] : vector<256x512xf32> to vector<256xf32>
    %6 = vector.shape_cast %5 : vector<256xf32> to vector<256x1xf32>
    %7 = arith.addf %3, %6 : vector<256x1xf32>
    %c0_4 = arith.constant 0 : index
    %c0_5 = arith.constant 0 : index
    %8 = vector.load %arg3[%c0_4, %c0_5] : memref<256x1xf32, #tpu.memory_space<vmem>>, vector<256x1xf32>
    tpu.vector_store %arg3[%c0_4, %c0_5], %7 {strides = array<i32>} : memref<256x1xf32, #tpu.memory_space<vmem>>, vector<256x1xf32>,
    %c0_i32_6 = arith.constant 0 : i32
    %9 = arith.cmpi eq, %arg1, %c0_i32_6 : i32
    %10 = arith.extui %9 : i1 to i32
    %c0_i32_7 = arith.constant 0 : i32
    %11 = arith.cmpi ne, %10, %c0_i32_7 : i32
    scf.if %11 {
      %c0_8 = arith.constant 0 : index
      %c0_9 = arith.constant 0 : index
      %12 = vector.load %arg3[%c0_8, %c0_9] : memref<256x1xf32, #tpu.memory_space<vmem>>, vector<256x1xf32>
      %cst_10 = arith.constant 1.000000e+00 : f32
      %13 = vector.broadcast %cst_10 : f32 to vector<256x1xf32>
      %14 = arith.addf %12, %13 : vector<256x1xf32>
      %15 = math.rsqrt %14 : vector<256x1xf32>
      %c0_11 = arith.constant 0 : index
      %c0_12 = arith.constant 0 : index
      %16 = vector.load %arg3[%c0_11, %c0_12] : memref<256x1xf32, #tpu.memory_space<vmem>>, vector<256x1xf32>
      tpu.vector_store %arg3[%c0_11, %c0_12], %15 {strides = array<i32>} : memref<256x1xf32, #tpu.memory_space<vmem>>, vector<256x1xf32>,
    } else {
    }
    return
  }
  func.func @transform_0(%arg0: i32, %arg1: i32) -> (i32, i32) {
    %c0_i32 = arith.constant 0 : i32
    return %arg0, %arg1 : i32, i32
  }
  func.func @transform_1(%arg0: i32, %arg1: i32) -> (i32, i32) {
    %c0_i32 = arith.constant 0 : i32
    %c0_i32_0 = arith.constant 0 : i32
    return %arg0, %c0_i32 : i32, i32
  }
}

</mosaic_0001>

<bundles_post_ra>
// kernel: cog_prepare.1
= control target key start
LH: loop header
LB: loop body
LE: loop exit
PB: predicated region body
PF: predicated region fallthrough
CT: control target
= control target key end

     0   :  { %s912_s6 = smov 0   ;;  %s914_s7 = smov 0   ;;  %s1333_s0 = inlined_call_operand.vmem [shape: f32[512,512], index: 0, kind: input, shape index: {}]   ;;  %s1334_s1 = inlined_call_operand.vmem [shape: f32[512,1], index: 1, kind: output, shape index: {}]  }
   0x1   :  { %s916_s8 = smov 0  }
   0x2 LB: > { %s23_s9 = sadd.s32 1, %s895_s7  ;;  %p779_p0 = scmp.ge.s32.totalorder %s899_s8, 1  ;;  %s899_s8 = sphi %s916_s8, %s11_s8   ;;  %s895_s7 = sphi %s914_s7, %s1336_s7   ;;  %s891_s6 = sphi %s912_s6, %s1335_s6  }
   0x3   : > { %p25_p1 = scmp.ge.s32.totalorder %s23_s9, 2  ;;  %p108_p2 = scmp.lt.s32.totalorder %s899_s8, 3 }
   0x5   : > { %s1338_s9 = smov (%p25_p1, %s23_s9), 0  ;;  %p109_p3 = pnand %p779_p0, %p108_p2 }
   0x6   : > { %s780_s10 = sshll.u32 (!%p109_p3), %s891_s6, 5  ;;  %vm155_vm0 = vcmask (!%p109_p3), 7168   ;;  %v901_v3 = vmov (!%p109_p3), 0.0  }
   0x7   : > { %112 = sbr.rel (%p109_p3) target bundleno = 252 (0xfc), region = 24  ;;  %p135_p4 = scmp.lt.s32.totalorder (!%p109_p3), %s780_s10, 63 }
   0xe   : > { %s1340_s10 = smov (!%p135_p4, %s780_s10), 63 }
   0xf   : > { %s787_s11 = sshll.u32 %s1340_s10, 5  ;;  %s784_s12 = sshll.u32 %s1340_s10, 3 }
  0x10   : > { %s933_s15 = scalar_lea.vmem %s1333_s0, %s787_s11  ;;  %s938_s18 = scalar_lea.vmem %s1334_s1, %s784_s12 }
  0x11   : > { %v228_v0 = vld [vmem:[%s933_s15 + $0x40] sm:$0xff]  ;;  %v229_v1 = vld [vmem:[%s933_s15 + $0x48] sm:$0xff]  ;;  %v230_v2 = vld [vmem:[%s933_s15 + $0x50] sm:$0xff]  ;;  %158 = vst.msk [vmem:[%s938_s18 + $0x10] sm:$0xff] %vm155_vm0, %v901_v3 }
  0x12   : > { %156 = vst.msk [vmem:[%s938_s18] sm:$0xff] %vm155_vm0, %v901_v3  ;;  %157 = vst.msk [vmem:[%s938_s18 + $0x8] sm:$0xff] %vm155_vm0, %v901_v3  ;;  %v358_v4 = vadd.f32 %v229_v1, %v228_v0  ;;  %v220_v5 = vld [vmem:[%s933_s15] sm:$0xff]  ;;  %v221_v6 = vld [vmem:[%s933_s15 + $0x8] sm:$0xff] }
  0x13   : > { %159 = vst.msk [vmem:[%s938_s18 + $0x18] sm:$0xff] %vm155_vm0, %v901_v3  ;;  %160 = vst.msk [vmem:[%s938_s18 + $0x20] sm:$0xff] %vm155_vm0, %v901_v3  ;;  %v231_v7 = vld [vmem:[%s933_s15 + $0x58] sm:$0xff]  ;;  %v222_v8 = vld [vmem:[%s933_s15 + $0x10] sm:$0xff]  ;;  %v348_v9 = vadd.f32 %v221_v6, %v220_v5 }
  0x14   : > { %161 = vst.msk [vmem:[%s938_s18 + $0x28] sm:$0xff] %vm155_vm0, %v901_v3  ;;  %162 = vst.msk [vmem:[%s938_s18 + $0x30] sm:$0xff] %vm155_vm0, %v901_v3  ;;  %v232_v10 = vld [vmem:[%s933_s15 + $0x60] sm:$0xff]  ;;  %v359_v11 = vadd.f32 %v358_v4, %v230_v2  ;;  %v223_v12 = vld [vmem:[%s933_s15 + $0x18] sm:$0xff] }
  0x15   : > { %163 = vst.msk [vmem:[%s938_s18 + $0x38] sm:$0xff] %vm155_vm0, %v901_v3  ;;  %164 = vst.msk [vmem:[%s938_s18 + $0x40] sm:$0xff] %vm155_vm0, %v901_v3  ;;  %v233_v13 = vld [vmem:[%s933_s15 + $0x68] sm:$0xff]  ;;  %v234_v14 = vld [vmem:[%s933_s15 + $0x70] sm:$0xff]  ;;  %v349_v15 = vadd.f32 %v348_v9, %v222_v8 }
  0x16   : > { %165 = vst.msk [vmem:[%s938_s18 + $0x48] sm:$0xff] %vm155_vm0, %v901_v3  ;;  %166 = vst.msk [vmem:[%s938_s18 + $0x50] sm:$0xff] %vm155_vm0, %v901_v3  ;;  %v363_v16 = vadd.f32 %v233_v13, %v232_v10  ;;  %v224_v17 = vld [vmem:[%s933_s15 + $0x20] sm:$0xff]  ;;  %v225_v18 = vld [vmem:[%s933_s15 + $0x28] sm:$0xff]  ;;  %v360_v20 = vadd.f32 %v359_v11, %v231_v7 }
  0x17   : > { %167 = vst.msk [vmem:[%s938_s18 + $0x58] sm:$0xff] %vm155_vm0, %v901_v3  ;;  %168 = vst.msk [vmem:[%s938_s18 + $0x60] sm:$0xff] %vm155_vm0, %v901_v3  ;;  %v226_v19 = vld [vmem:[%s933_s15 + $0x30] sm:$0xff]  ;;  %v235_v21 = vld [vmem:[%s933_s15 + $0x78] sm:$0xff]  ;;  %v353_v22 = vadd.f32 %v225_v18, %v224_v17  ;;  %v350_v25 = vadd.f32 %v349_v15, %v223_v12 }
  0x18   : > { %169 = vst.msk [vmem:[%s938_s18 + $0x68] sm:$0xff] %vm155_vm0, %v901_v3  ;;  %170 = vst.msk [vmem:[%s938_s18 + $0x70] sm:$0xff] %vm155_vm0, %v901_v3  ;;  %v240_v23 = vld [vmem:[%s933_s15 + $0xa0] sm:$0xff]  ;;  %v241_v24 = vld [vmem:[%s933_s15 + $0xa8] sm:$0xff]  ;;  %v364_v26 = vadd.f32 %v363_v16, %v234_v14  ;;  %361 = vadd.xlane.f32.xlu1 %v360_v20 }
  0x19   : > { %171 = vst.msk [vmem:[%s938_s18 + $0x78] sm:$0xff] %vm155_vm0, %v901_v3  ;;  %172 = vst.msk [vmem:[%s938_s18 + $0x80] sm:$0xff] %vm155_vm0, %v901_v3  ;;  %v227_v27 = vld [vmem:[%s933_s15 + $0x38] sm:$0xff]  ;;  %v242_v28 = vld [vmem:[%s933_s15 + $0xb0] sm:$0xff]  ;;  %v373_v29 = vadd.f32 %v241_v24, %v240_v23  ;;  %v354_v31 = vadd.f32 %v353_v22, %v226_v19  ;;  %351 = vadd.xlane.f32.xlu0 %v350_v25 }
  0x1a   : > { %173 = vst.msk [vmem:[%s938_s18 + $0x88] sm:$0xff] %vm155_vm0, %v901_v3  ;;  %174 = vst.msk [vmem:[%s938_s18 + $0x90] sm:$0xff] %vm155_vm0, %v901_v3  ;;  %v236_v30 = vld [vmem:[%s933_s15 + $0x80] sm:$0xff]  ;;  %v243_v32 = vld [vmem:[%s933_s15 + $0xb8] sm:$0xff]  ;;  %v365_v35 = vadd.f32 %v364_v26, %v235_v21 }
  0x1b   : > { %175 = vst.msk [vmem:[%s938_s18 + $0x98] sm:$0xff] %vm155_vm0, %v901_v3  ;;  %176 = vst.msk [vmem:[%s938_s18 + $0xa0] sm:$0xff] %vm155_vm0, %v901_v3  ;;  %v237_v33 = vld [vmem:[%s933_s15 + $0x88] sm:$0xff]  ;;  %v238_v34 = vld [vmem:[%s933_s15 + $0x90] sm:$0xff]  ;;  %v374_v36 = vadd.f32 %v373_v29, %v242_v28  ;;  %v355_v41 = vadd.f32 %v354_v31, %v227_v27 }
  0x1c   : > { %177 = vst.msk [vmem:[%s938_s18 + $0xa8] sm:$0xff] %vm155_vm0, %v901_v3  ;;  %178 = vst.msk [vmem:[%s938_s18 + $0xb0] sm:$0xff] %vm155_vm0, %v901_v3  ;;  %v368_v37 = vadd.f32 %v237_v33, %v236_v30  ;;  %v248_v38 = vld [vmem:[%s933_s15 + $0xe0] sm:$0xff]  ;;  %v249_v39 = vld [vmem:[%s933_s15 + $0xe8] sm:$0xff]  ;;  %366 = vadd.xlane.f32.xlu1 %v365_v35 }
  0x1d   : > { %179 = vst.msk [vmem:[%s938_s18 + $0xb8] sm:$0xff] %vm155_vm0, %v901_v3  ;;  %180 = vst.msk [vmem:[%s938_s18 + $0xc0] sm:$0xff] %vm155_vm0, %v901_v3  ;;  %v250_v40 = vld [vmem:[%s933_s15 + $0xf0] sm:$0xff]  ;;  %v239_v42 = vld [vmem:[%s933_s15 + $0x98] sm:$0xff]  ;;  %v383_v43 = vadd.f32 %v249_v39, %v248_v38  ;;  %v375_v50 = vadd.f32 %v374_v36, %v243_v32  ;;  %356 = vadd.xlane.f32.xlu0 %v355_v41 }
  0x1e   : > { %181 = vst.msk [vmem:[%s938_s18 + $0xc8] sm:$0xff] %vm155_vm0, %v901_v3  ;;  %182 = vst.msk [vmem:[%s938_s18 + $0xd0] sm:$0xff] %vm155_vm0, %v901_v3  ;;  %v244_v44 = vld [vmem:[%s933_s15 + $0xc0] sm:$0xff]  ;;  %v245_v45 = vld [vmem:[%s933_s15 + $0xc8] sm:$0xff]  ;;  %v369_v46 = vadd.f32 %v368_v37, %v238_v34 }
  0x1f   : > { %183 = vst.msk [vmem:[%s938_s18 + $0xd8] sm:$0xff] %vm155_vm0, %v901_v3  ;;  %184 = vst.msk [vmem:[%s938_s18 + $0xe0] sm:$0xff] %vm155_vm0, %v901_v3  ;;  %v246_v47 = vld [vmem:[%s933_s15 + $0xd0] sm:$0xff]  ;;  %v378_v48 = vadd.f32 %v245_v45, %v244_v44  ;;  %v256_v49 = vld [vmem:[%s933_s15 + $0x120] sm:$0xff]  ;;  %v384_v52 = vadd.f32 %v383_v43, %v250_v40 }
  0x20   : > { %185 = vst.msk [vmem:[%s938_s18 + $0xe8] sm:$0xff] %vm155_vm0, %v901_v3  ;;  %186 = vst.msk [vmem:[%s938_s18 + $0xf0] sm:$0xff] %vm155_vm0, %v901_v3  ;;  %v251_v51 = vld [vmem:[%s933_s15 + $0xf8] sm:$0xff]  ;;  %v257_v54 = vld [vmem:[%s933_s15 + $0x128] sm:$0xff]  ;;  %v370_v55 = vadd.f32 %v369_v46, %v239_v42  ;;  %376 = vadd.xlane.f32.xlu1 %v375_v50 }
  0x21   : > { %187 = vst.msk [vmem:[%s938_s18 + $0xf8] sm:$0xff] %vm155_vm0, %v901_v3  ;;  %v247_v53 = vld [vmem:[%s933_s15 + $0xd8] sm:$0xff]  ;;  %v379_v56 = vadd.f32 %v378_v48, %v246_v47  ;;  %v258_v57 = vld [vmem:[%s933_s15 + $0x130] sm:$0xff]  ;;  %v393_v58 = vadd.f32 %v257_v54, %v256_v49  ;;  %v252_v59 = vld [vmem:[%s933_s15 + $0x100] sm:$0xff]  ;;  %v385_v2 = vadd.f32 %v384_v52, %v251_v51 }
  0x22   : > { %v253_v60 = vld [vmem:[%s933_s15 + $0x108] sm:$0xff]  ;;  %v254_v61 = vld [vmem:[%s933_s15 + $0x110] sm:$0xff]  ;;  %v264_v63 = vld [vmem:[%s933_s15 + $0x160] sm:$0xff]  ;;  %371 = vadd.xlane.f32.xlu0 %v370_v55 }
  0x23   : > { %v388_v62 = vadd.f32 %v253_v60, %v252_v59  ;;  %v265_v0 = vld [vmem:[%s933_s15 + $0x168] sm:$0xff]  ;;  %v260_v1 = vld [vmem:[%s933_s15 + $0x140] sm:$0xff]  ;;  %v259_v3 = vld [vmem:[%s933_s15 + $0x138] sm:$0xff]  ;;  %v394_v4 = vadd.f32 %v393_v58, %v258_v57  ;;  %v380_v8 = vadd.f32 %v379_v56, %v247_v53 }
  0x24   : > { %v255_v5 = vld [vmem:[%s933_s15 + $0x118] sm:$0xff]  ;;  %v403_v6 = vadd.f32 %v265_v0, %v264_v63  ;;  %v261_v7 = vld [vmem:[%s933_s15 + $0x148] sm:$0xff]  ;;  %v266_v10 = vld [vmem:[%s933_s15 + $0x170] sm:$0xff]  ;;  %386 = vadd.xlane.f32.xlu1 %v385_v2 }
  0x25   : > { %v389_v9 = vadd.f32 %v388_v62, %v254_v61  ;;  %v398_v11 = vadd.f32 %v261_v7, %v260_v1  ;;  %v272_v12 = vld [vmem:[%s933_s15 + $0x1a0] sm:$0xff]  ;;  %v273_v13 = vld [vmem:[%s933_s15 + $0x1a8] sm:$0xff]  ;;  %v262_v14 = vld [vmem:[%s933_s15 + $0x150] sm:$0xff]  ;;  %v395_v17 = vadd.f32 %v394_v4, %v259_v3 }
  0x26   : > { %v268_v15 = vld [vmem:[%s933_s15 + $0x180] sm:$0xff]  ;;  %v269_v16 = vld [vmem:[%s933_s15 + $0x188] sm:$0xff]  ;;  %v267_v18 = vld [vmem:[%s933_s15 + $0x178] sm:$0xff]  ;;  %v404_v19 = vadd.f32 %v403_v6, %v266_v10  ;;  %v413_v21 = vadd.f32 %v273_v13, %v272_v12  ;;  %381 = vadd.xlane.f32.xlu0 %v380_v8 }
  0x27   : > { %v263_v20 = vld [vmem:[%s933_s15 + $0x158] sm:$0xff]  ;;  %v390_v22 = vadd.f32 %v389_v9, %v255_v5  ;;  %v399_v23 = vadd.f32 %v398_v11, %v262_v14  ;;  %v274_v24 = vld [vmem:[%s933_s15 + $0x1b0] sm:$0xff]  ;;  %v408_v25 = vadd.f32 %v269_v16, %v268_v15  ;;  %v280_v26 = vld [vmem:[%s933_s15 + $0x1e0] sm:$0xff] }
  0x28   : > { %v281_v27 = vld [vmem:[%s933_s15 + $0x1e8] sm:$0xff]  ;;  %v270_v28 = vld [vmem:[%s933_s15 + $0x190] sm:$0xff]  ;;  %v276_v29 = vld [vmem:[%s933_s15 + $0x1c0] sm:$0xff]  ;;  %396 = vadd.xlane.f32.xlu1 %v395_v17  ;;  %v405_v31 = vadd.f32 %v404_v19, %v267_v18  ;;  %v414_v33 = vadd.f32 %v413_v21, %v274_v24 }
  0x29   : > { %v277_v30 = vld [vmem:[%s933_s15 + $0x1c8] sm:$0xff]  ;;  %v275_v32 = vld [vmem:[%s933_s15 + $0x1b8] sm:$0xff]  ;;  %v423_v35 = vadd.f32 %v281_v27, %v280_v26  ;;  %v400_v36 = vadd.f32 %v399_v23, %v263_v20  ;;  %v409_v37 = vadd.f32 %v408_v25, %v270_v28  ;;  %v282_v38 = vld [vmem:[%s933_s15 + $0x1f0] sm:$0xff] }
  0x2a   : > { %v271_v34 = vld [vmem:[%s933_s15 + $0x198] sm:$0xff]  ;;  %391 = vadd.xlane.f32.xlu0 %v390_v22  ;;  %v418_v39 = vadd.f32 %v277_v30, %v276_v29  ;;  %v288_v40 = vld [vmem:[%s933_s15 + $0x220] sm:$0xff]  ;;  %v289_v41 = vld [vmem:[%s933_s15 + $0x228] sm:$0xff]  ;;  %v415_v45 = vadd.f32 %v414_v33, %v275_v32 }
  0x2b   : > { %v278_v42 = vld [vmem:[%s933_s15 + $0x1d0] sm:$0xff]  ;;  %v284_v43 = vld [vmem:[%s933_s15 + $0x200] sm:$0xff]  ;;  %v285_v44 = vld [vmem:[%s933_s15 + $0x208] sm:$0xff]  ;;  %v424_v47 = vadd.f32 %v423_v35, %v282_v38  ;;  %v433_v49 = vadd.f32 %v289_v41, %v288_v40  ;;  %v410_v50 = vadd.f32 %v409_v37, %v271_v34 }
  0x2c   : > { %406 = vadd.xlane.f32.xlu1 %v405_v31  ;;  %v283_v46 = vld [vmem:[%s933_s15 + $0x1f8] sm:$0xff]  ;;  %v419_v51 = vadd.f32 %v418_v39, %v278_v42  ;;  %v290_v52 = vld [vmem:[%s933_s15 + $0x230] sm:$0xff]  ;;  %v428_v53 = vadd.f32 %v285_v44, %v284_v43  ;;  %v296_v54 = vld [vmem:[%s933_s15 + $0x260] sm:$0xff] }
  0x2d   : > { %v279_v48 = vld [vmem:[%s933_s15 + $0x1d8] sm:$0xff]  ;;  %v297_v55 = vld [vmem:[%s933_s15 + $0x268] sm:$0xff]  ;;  %v286_v56 = vld [vmem:[%s933_s15 + $0x210] sm:$0xff]  ;;  %v425_v59 = vadd.f32 %v424_v47, %v283_v46  ;;  %v434_v61 = vadd.f32 %v433_v49, %v290_v52 }
  0x2e   : > { %401 = vadd.xlane.f32.xlu0 %v400_v36  ;;  %v292_v57 = vld [vmem:[%s933_s15 + $0x240] sm:$0xff]  ;;  %v293_v58 = vld [vmem:[%s933_s15 + $0x248] sm:$0xff]  ;;  %v291_v60 = vld [vmem:[%s933_s15 + $0x238] sm:$0xff]  ;;  %v443_v63 = vadd.f32 %v297_v55, %v296_v54  ;;  %v420_v0 = vadd.f32 %v419_v51, %v279_v48  ;;  %v429_v1 = vadd.f32 %v428_v53, %v286_v56 }
  0x2f   : > { %v287_v62 = vld [vmem:[%s933_s15 + $0x218] sm:$0xff]  ;;  %v298_v2 = vld [vmem:[%s933_s15 + $0x270] sm:$0xff]  ;;  %v438_v3 = vadd.f32 %v293_v58, %v292_v57  ;;  %v304_v4 = vld [vmem:[%s933_s15 + $0x2a0] sm:$0xff]  ;;  %v435_v9 = vadd.f32 %v434_v61, %v291_v60 }
  0x30   : > { %416 = vadd.xlane.f32.xlu1 %v415_v45  ;;  %v305_v5 = vld [vmem:[%s933_s15 + $0x2a8] sm:$0xff]  ;;  %v294_v6 = vld [vmem:[%s933_s15 + $0x250] sm:$0xff]  ;;  %v300_v7 = vld [vmem:[%s933_s15 + $0x280] sm:$0xff]  ;;  %v444_v11 = vadd.f32 %v443_v63, %v298_v2  ;;  %v430_v14 = vadd.f32 %v429_v1, %v287_v62 }
  0x31   : > { %v301_v8 = vld [vmem:[%s933_s15 + $0x288] sm:$0xff]  ;;  %v299_v10 = vld [vmem:[%s933_s15 + $0x278] sm:$0xff]  ;;  %v453_v13 = vadd.f32 %v305_v5, %v304_v4  ;;  %v439_v15 = vadd.f32 %v438_v3, %v294_v6  ;;  %v306_v16 = vld [vmem:[%s933_s15 + $0x2b0] sm:$0xff] }
  0x32   : > { %411 = vadd.xlane.f32.xlu0 %v410_v50  ;;  %v295_v12 = vld [vmem:[%s933_s15 + $0x258] sm:$0xff]  ;;  %v448_v17 = vadd.f32 %v301_v8, %v300_v7  ;;  %v312_v18 = vld [vmem:[%s933_s15 + $0x2e0] sm:$0xff]  ;;  %v313_v19 = vld [vmem:[%s933_s15 + $0x2e8] sm:$0xff]  ;;  %v445_v23 = vadd.f32 %v444_v11, %v299_v10 }
  0x33   : > { %v302_v20 = vld [vmem:[%s933_s15 + $0x290] sm:$0xff]  ;;  %v308_v21 = vld [vmem:[%s933_s15 + $0x2c0] sm:$0xff]  ;;  %v309_v22 = vld [vmem:[%s933_s15 + $0x2c8] sm:$0xff]  ;;  %v454_v25 = vadd.f32 %v453_v13, %v306_v16  ;;  %v463_v27 = vadd.f32 %v313_v19, %v312_v18  ;;  %v440_v28 = vadd.f32 %v439_v15, %v295_v12 }
  0x34   : > { %426 = vadd.xlane.f32.xlu1 %v425_v59  ;;  %v307_v24 = vld [vmem:[%s933_s15 + $0x2b8] sm:$0xff]  ;;  %v449_v29 = vadd.f32 %v448_v17, %v302_v20  ;;  %v314_v30 = vld [vmem:[%s933_s15 + $0x2f0] sm:$0xff]  ;;  %v458_v31 = vadd.f32 %v309_v22, %v308_v21  ;;  %v320_v32 = vld [vmem:[%s933_s15 + $0x320] sm:$0xff] }
  0x35   : > { %v303_v26 = vld [vmem:[%s933_s15 + $0x298] sm:$0xff]  ;;  %v321_v33 = vld [vmem:[%s933_s15 + $0x328] sm:$0xff]  ;;  %v310_v34 = vld [vmem:[%s933_s15 + $0x2d0] sm:$0xff]  ;;  %v455_v37 = vadd.f32 %v454_v25, %v307_v24  ;;  %v464_v39 = vadd.f32 %v463_v27, %v314_v30 }
  0x36   : > { %421 = vadd.xlane.f32.xlu0 %v420_v0  ;;  %v316_v35 = vld [vmem:[%s933_s15 + $0x300] sm:$0xff]  ;;  %v317_v36 = vld [vmem:[%s933_s15 + $0x308] sm:$0xff]  ;;  %v315_v38 = vld [vmem:[%s933_s15 + $0x2f8] sm:$0xff]  ;;  %v473_v41 = vadd.f32 %v321_v33, %v320_v32  ;;  %v450_v42 = vadd.f32 %v449_v29, %v303_v26  ;;  %v459_v43 = vadd.f32 %v458_v31, %v310_v34 }
  0x37   : > { %v311_v40 = vld [vmem:[%s933_s15 + $0x2d8] sm:$0xff]  ;;  %v322_v44 = vld [vmem:[%s933_s15 + $0x330] sm:$0xff]  ;;  %v468_v45 = vadd.f32 %v317_v36, %v316_v35  ;;  %v328_v46 = vld [vmem:[%s933_s15 + $0x360] sm:$0xff]  ;;  %v465_v51 = vadd.f32 %v464_v39, %v315_v38 }
  0x38   : > { %436 = vadd.xlane.f32.xlu1 %v435_v9  ;;  %v329_v47 = vld [vmem:[%s933_s15 + $0x368] sm:$0xff]  ;;  %v318_v48 = vld [vmem:[%s933_s15 + $0x310] sm:$0xff]  ;;  %v324_v49 = vld [vmem:[%s933_s15 + $0x340] sm:$0xff]  ;;  %v474_v53 = vadd.f32 %v473_v41, %v322_v44  ;;  %v460_v56 = vadd.f32 %v459_v43, %v311_v40 }
  0x39   : > { %v325_v50 = vld [vmem:[%s933_s15 + $0x348] sm:$0xff]  ;;  %v323_v52 = vld [vmem:[%s933_s15 + $0x338] sm:$0xff]  ;;  %v483_v55 = vadd.f32 %v329_v47, %v328_v46  ;;  %v469_v57 = vadd.f32 %v468_v45, %v318_v48  ;;  %v330_v58 = vld [vmem:[%s933_s15 + $0x370] sm:$0xff] }
  0x3a   : > { %431 = vadd.xlane.f32.xlu0 %v430_v14  ;;  %v319_v54 = vld [vmem:[%s933_s15 + $0x318] sm:$0xff]  ;;  %v478_v59 = vadd.f32 %v325_v50, %v324_v49  ;;  %v336_v60 = vld [vmem:[%s933_s15 + $0x3a0] sm:$0xff]  ;;  %v337_v61 = vld [vmem:[%s933_s15 + $0x3a8] sm:$0xff]  ;;  %v475_v1 = vadd.f32 %v474_v53, %v323_v52 }
  0x3b   : > { %v326_v62 = vld [vmem:[%s933_s15 + $0x350] sm:$0xff]  ;;  %v332_v63 = vld [vmem:[%s933_s15 + $0x380] sm:$0xff]  ;;  %v333_v0 = vld [vmem:[%s933_s15 + $0x388] sm:$0xff]  ;;  %v484_v3 = vadd.f32 %v483_v55, %v330_v58  ;;  %v493_v5 = vadd.f32 %v337_v61, %v336_v60  ;;  %v470_v6 = vadd.f32 %v469_v57, %v319_v54 }
  0x3c   : > { %446 = vadd.xlane.f32.xlu1 %v445_v23  ;;  %v331_v2 = vld [vmem:[%s933_s15 + $0x378] sm:$0xff]  ;;  %v479_v7 = vadd.f32 %v478_v59, %v326_v62  ;;  %v338_v8 = vld [vmem:[%s933_s15 + $0x3b0] sm:$0xff]  ;;  %v488_v9 = vadd.f32 %v333_v0, %v332_v63  ;;  %v344_v10 = vld [vmem:[%s933_s15 + $0x3e0] sm:$0xff] }
  0x3d   : > { %v327_v4 = vld [vmem:[%s933_s15 + $0x358] sm:$0xff]  ;;  %v345_v11 = vld [vmem:[%s933_s15 + $0x3e8] sm:$0xff]  ;;  %v334_v12 = vld [vmem:[%s933_s15 + $0x390] sm:$0xff]  ;;  %v485_v15 = vadd.f32 %v484_v3, %v331_v2  ;;  %v494_v16 = vadd.f32 %v493_v5, %v338_v8 }
  0x3e   : > { %441 = vadd.xlane.f32.xlu0 %v440_v28  ;;  %v340_v13 = vld [vmem:[%s933_s15 + $0x3c0] sm:$0xff]  ;;  %v341_v14 = vld [vmem:[%s933_s15 + $0x3c8] sm:$0xff]  ;;  %v503_v17 = vadd.f32 %v345_v11, %v344_v10  ;;  %v480_v18 = vadd.f32 %v479_v7, %v327_v4  ;;  %v339_v19 = vld [vmem:[%s933_s15 + $0x3b8] sm:$0xff]  ;;  %v489_v20 = vadd.f32 %v488_v9, %v334_v12 }
  0x3f   : > { %v346_v21 = vld [vmem:[%s933_s15 + $0x3f0] sm:$0xff]  ;;  %v498_v22 = vadd.f32 %v341_v14, %v340_v13  ;;  %v335_v23 = vld [vmem:[%s933_s15 + $0x398] sm:$0xff]  ;;  %v495_v25 = vadd.f32 %v494_v16, %v339_v19  ;;  %v188_v34 = vld [vmem:[%s938_s18] sm:$0xff] }
  0x40   : > { %456 = vadd.xlane.f32.xlu1 %v455_v37  ;;  %v342_v24 = vld [vmem:[%s933_s15 + $0x3d0] sm:$0xff]  ;;  %v504_v26 = vadd.f32 %v503_v17, %v346_v21  ;;  %v490_v27 = vadd.f32 %v489_v20, %v335_v23  ;;  %v347_v28 = vld [vmem:[%s933_s15 + $0x3f8] sm:$0xff]  ;;  %v189_v40 = vld [vmem:[%s938_s18 + $0x8] sm:$0xff] }
  0x41   : > { %v499_v29 = vadd.f32 %v498_v22, %v342_v24  ;;  %v343_v30 = vld [vmem:[%s933_s15 + $0x3d8] sm:$0xff]  ;;  %v190_v33 = vld [vmem:[%s938_s18 + $0x10] sm:$0xff]  ;;  %v193_v45 = vld [vmem:[%s938_s18 + $0x28] sm:$0xff] }
  0x42   : > { %451 = vadd.xlane.f32.xlu0 %v450_v42  ;;  %v505_v31 = vadd.f32 %v504_v26, %v347_v28  ;;  %v191_v39 = vld [vmem:[%s938_s18 + $0x18] sm:$0xff]  ;;  %v192_v46 = vld [vmem:[%s938_s18 + $0x20] sm:$0xff]  ;;  %v194_v55 = vld [vmem:[%s938_s18 + $0x30] sm:$0xff] }
  0x43   : > { %v500_v32 = vadd.f32 %v499_v29, %v343_v30  ;;  %v195_v52 = vld [vmem:[%s938_s18 + $0x38] sm:$0xff]  ;;  %v197_v62 = vld [vmem:[%s938_s18 + $0x48] sm:$0xff]  ;;  %v198_v11 = vld [vmem:[%s938_s18 + $0x50] sm:$0xff] }
  0x44   : > { %466 = vadd.xlane.f32.xlu1 %v465_v51  ;;  %v199_v8 = vld [vmem:[%s938_s18 + $0x58] sm:$0xff]  ;;  %v200_v22 = vld [vmem:[%s938_s18 + $0x60] sm:$0xff] }
  0x45   : > { %v203_v30 = vld [vmem:[%s938_s18 + $0x78] sm:$0xff] }
  0x46   : > { %461 = vadd.xlane.f32.xlu0 %v460_v56 }
  0x48   : > { %476 = vadd.xlane.f32.xlu1 %v475_v1  ;;  %v196_v1 = vld [vmem:[%s938_s18 + $0x40] sm:$0xff] }
  0x4a   : > { %471 = vadd.xlane.f32.xlu0 %v470_v6 }
  0x4c   : > { %486 = vadd.xlane.f32.xlu1 %v485_v15 }
  0x4e   : > { %481 = vadd.xlane.f32.xlu0 %v480_v18  ;;  %v201_v18 = vld [vmem:[%s938_s18 + $0x68] sm:$0xff] }
  0x50   : > { %496 = vadd.xlane.f32.xlu1 %v495_v25 }
  0x52   : > { %491 = vadd.xlane.f32.xlu0 %v490_v27 }
  0x54   : > { %506 = vadd.xlane.f32.xlu1 %v505_v31 }
  0x56   : > { %501 = vadd.xlane.f32.xlu0 %v500_v32 }
  0xa5   : > { %v362_v35 = vpop.xlane.xlu1 %361 }
  0xa6   : > { %v510_v36 = vadd.f32 %v362_v35, %v190_v33  ;;  %v352_v37 = vpop.xlane.xlu0 %351 }
  0xa7   : > { %v508_v38 = vadd.f32 %v352_v37, %v188_v34  ;;  %v202_v34 = vld [vmem:[%s938_s18 + $0x70] sm:$0xff] }
  0xa8   : > { %543 = vst.msk [vmem:[%s938_s18 + $0x10] sm:$0xff] %vm155_vm0, %v510_v36 }
  0xa9   : > { %541 = vst.msk [vmem:[%s938_s18] sm:$0xff] %vm155_vm0, %v508_v38  ;;  %v367_v41 = vpop.xlane.xlu1 %366 }
  0xaa   : > { %v511_v42 = vadd.f32 %v367_v41, %v191_v39  ;;  %v357_v43 = vpop.xlane.xlu0 %356 }
  0xab   : > { %v509_v44 = vadd.f32 %v357_v43, %v189_v40 }
  0xac   : > { %544 = vst.msk [vmem:[%s938_s18 + $0x18] sm:$0xff] %vm155_vm0, %v511_v42  ;;  %v205_v42 = vld [vmem:[%s938_s18 + $0x88] sm:$0xff] }
  0xad   : > { %542 = vst.msk [vmem:[%s938_s18 + $0x8] sm:$0xff] %vm155_vm0, %v509_v44  ;;  %v377_v47 = vpop.xlane.xlu1 %376 }
  0xae   : > { %v513_v48 = vadd.f32 %v377_v47, %v193_v45 }
  0xaf   : > { %v372_v49 = vpop.xlane.xlu0 %371  ;;  %v578_v50 = vld [vmem:[%s938_s18 + $0x10] sm:$0xff] }
  0xb0   : > { %v512_v51 = vadd.f32 %v372_v49, %v192_v46  ;;  %v610_v53 = vadd.f32 1.0, %v578_v50  ;;  %v576_v54 = vld [vmem:[%s938_s18] sm:$0xff]  ;;  %546 = vst.msk [vmem:[%s938_s18 + $0x28] sm:$0xff] %vm155_vm0, %v513_v48 }
  0xb1   : > { %v608_v56 = vadd.f32 1.0, %v576_v54  ;;  %v387_v57 = vpop.xlane.xlu1 %386  ;;  %v204_v46 = vld [vmem:[%s938_s18 + $0x80] sm:$0xff]  ;;  %v207_v54 = vld [vmem:[%s938_s18 + $0x98] sm:$0xff] }
  0xb2   : > { %545 = vst.msk [vmem:[%s938_s18 + $0x20] sm:$0xff] %vm155_vm0, %v512_v51  ;;  %813 = vrsqrt.f32 %v610_v53  ;;  %v515_v58 = vadd.f32 %v387_v57, %v195_v52 }
  0xb3   : > { %v382_v59 = vpop.xlane.xlu0 %381  ;;  %815 = vrsqrt.f32 %v608_v56  ;;  %v579_v60 = vld [vmem:[%s938_s18 + $0x18] sm:$0xff] }
  0xb4   : > { %v514_v61 = vadd.f32 %v382_v59, %v194_v55  ;;  %v611_v63 = vadd.f32 1.0, %v579_v60  ;;  %v577_v0 = vld [vmem:[%s938_s18 + $0x8] sm:$0xff]  ;;  %548 = vst.msk [vmem:[%s938_s18 + $0x38] sm:$0xff] %vm155_vm0, %v515_v58  ;;  %v206_v58 = vld [vmem:[%s938_s18 + $0x90] sm:$0xff] }
  0xb5   : > { %v609_v2 = vadd.f32 1.0, %v577_v0  ;;  %v397_v3 = vpop.xlane.xlu1 %396 }
  0xb6   : > { %547 = vst.msk [vmem:[%s938_s18 + $0x30] sm:$0xff] %vm155_vm0, %v514_v61  ;;  %817 = vrsqrt.f32 %v611_v63  ;;  %v517_v4 = vadd.f32 %v397_v3, %v197_v62 }
  0xb7   : > { %v392_v5 = vpop.xlane.xlu0 %391  ;;  %819 = vrsqrt.f32 %v609_v2  ;;  %v581_v6 = vld [vmem:[%s938_s18 + $0x28] sm:$0xff] }
  0xb8   : > { %v516_v7 = vadd.f32 %v392_v5, %v196_v1  ;;  %v613_v9 = vadd.f32 1.0, %v581_v6  ;;  %550 = vst.msk [vmem:[%s938_s18 + $0x48] sm:$0xff] %vm155_vm0, %v517_v4  ;;  %v209_v2 = vld [vmem:[%s938_s18 + $0xa8] sm:$0xff]  ;;  %v208_v6 = vld [vmem:[%s938_s18 + $0xa0] sm:$0xff] }
  0xb9   : > { %v580_v10 = vld [vmem:[%s938_s18 + $0x20] sm:$0xff]  ;;  %v407_v13 = vpop.xlane.xlu1 %406 }
  0xba   : > { %v612_v12 = vadd.f32 1.0, %v580_v10  ;;  %549 = vst.msk [vmem:[%s938_s18 + $0x40] sm:$0xff] %vm155_vm0, %v516_v7  ;;  %821 = vrsqrt.f32 %v613_v9  ;;  %v519_v14 = vadd.f32 %v407_v13, %v199_v8 }
  0xbb   : > { %v402_v15 = vpop.xlane.xlu0 %401  ;;  %v583_v16 = vld [vmem:[%s938_s18 + $0x38] sm:$0xff] }
  0xbc   : > { %823 = vrsqrt.f32 %v612_v12  ;;  %v518_v17 = vadd.f32 %v402_v15, %v198_v11  ;;  %v814_v19 = vpop.eup %813  ;;  %v615_v20 = vadd.f32 1.0, %v583_v16  ;;  %552 = vst.msk [vmem:[%s938_s18 + $0x58] sm:$0xff] %vm155_vm0, %v519_v14  ;;  %v211_v14 = vld [vmem:[%s938_s18 + $0xb8] sm:$0xff] }
  0xbd   : > { %v582_v21 = vld [vmem:[%s938_s18 + $0x30] sm:$0xff]  ;;  %v816_v23 = vpop.eup %815  ;;  %674 = vst.msk [vmem:[%s938_s18 + $0x10] sm:$0xff] %vm155_vm0, %v814_v19  ;;  %v417_v25 = vpop.xlane.xlu1 %416 }
  0xbe   : > { %v614_v24 = vadd.f32 1.0, %v582_v21  ;;  %551 = vst.msk [vmem:[%s938_s18 + $0x50] sm:$0xff] %vm155_vm0, %v518_v17  ;;  %672 = vst.msk [vmem:[%s938_s18] sm:$0xff] %vm155_vm0, %v816_v23  ;;  %825 = vrsqrt.f32 %v615_v20  ;;  %v521_v26 = vadd.f32 %v417_v25, %v201_v18  ;;  %v210_v18 = vld [vmem:[%s938_s18 + $0xb0] sm:$0xff] }
  0xbf   : > { %v412_v27 = vpop.xlane.xlu0 %411  ;;  %v585_v28 = vld [vmem:[%s938_s18 + $0x48] sm:$0xff] }
  0xc0   : > { %827 = vrsqrt.f32 %v614_v24  ;;  %v520_v29 = vadd.f32 %v412_v27, %v200_v22  ;;  %v818_v31 = vpop.eup %817  ;;  %v617_v32 = vadd.f32 1.0, %v585_v28  ;;  %554 = vst.msk [vmem:[%s938_s18 + $0x68] sm:$0xff] %vm155_vm0, %v521_v26  ;;  %v213_v26 = vld [vmem:[%s938_s18 + $0xc8] sm:$0xff] }
  0xc1   : > { %v584_v33 = vld [vmem:[%s938_s18 + $0x40] sm:$0xff]  ;;  %v820_v35 = vpop.eup %819  ;;  %675 = vst.msk [vmem:[%s938_s18 + $0x18] sm:$0xff] %vm155_vm0, %v818_v31  ;;  %v427_v37 = vpop.xlane.xlu1 %426 }
  0xc2   : > { %v616_v36 = vadd.f32 1.0, %v584_v33  ;;  %553 = vst.msk [vmem:[%s938_s18 + $0x60] sm:$0xff] %vm155_vm0, %v520_v29  ;;  %673 = vst.msk [vmem:[%s938_s18 + $0x8] sm:$0xff] %vm155_vm0, %v820_v35  ;;  %829 = vrsqrt.f32 %v617_v32  ;;  %v523_v38 = vadd.f32 %v427_v37, %v203_v30  ;;  %v212_v30 = vld [vmem:[%s938_s18 + $0xc0] sm:$0xff] }
  0xc3   : > { %v422_v39 = vpop.xlane.xlu0 %421  ;;  %v587_v40 = vld [vmem:[%s938_s18 + $0x58] sm:$0xff] }
  0xc4   : > { %831 = vrsqrt.f32 %v616_v36  ;;  %v522_v41 = vadd.f32 %v422_v39, %v202_v34  ;;  %v822_v43 = vpop.eup %821  ;;  %v619_v44 = vadd.f32 1.0, %v587_v40  ;;  %556 = vst.msk [vmem:[%s938_s18 + $0x78] sm:$0xff] %vm155_vm0, %v523_v38  ;;  %v215_v38 = vld [vmem:[%s938_s18 + $0xd8] sm:$0xff] }
  0xc5   : > { %v586_v45 = vld [vmem:[%s938_s18 + $0x50] sm:$0xff]  ;;  %677 = vst.msk [vmem:[%s938_s18 + $0x28] sm:$0xff] %vm155_vm0, %v822_v43  ;;  %v437_v49 = vpop.xlane.xlu1 %436 }
  0xc6   : > { %v824_v47 = vpop.eup %823  ;;  %v618_v48 = vadd.f32 1.0, %v586_v45  ;;  %555 = vst.msk [vmem:[%s938_s18 + $0x70] sm:$0xff] %vm155_vm0, %v522_v41  ;;  %833 = vrsqrt.f32 %v619_v44  ;;  %v525_v50 = vadd.f32 %v437_v49, %v205_v42  ;;  %v214_v42 = vld [vmem:[%s938_s18 + $0xd0] sm:$0xff] }
  0xc7   : > { %676 = vst.msk [vmem:[%s938_s18 + $0x20] sm:$0xff] %vm155_vm0, %v824_v47  ;;  %v432_v51 = vpop.xlane.xlu0 %431  ;;  %v589_v52 = vld [vmem:[%s938_s18 + $0x68] sm:$0xff] }
  0xc8   : > { %835 = vrsqrt.f32 %v618_v48  ;;  %v524_v53 = vadd.f32 %v432_v51, %v204_v46  ;;  %v826_v55 = vpop.eup %825  ;;  %v621_v56 = vadd.f32 1.0, %v589_v52  ;;  %558 = vst.msk [vmem:[%s938_s18 + $0x88] sm:$0xff] %vm155_vm0, %v525_v50  ;;  %v217_v50 = vld [vmem:[%s938_s18 + $0xe8] sm:$0xff] }
  0xc9   : > { %v588_v57 = vld [vmem:[%s938_s18 + $0x60] sm:$0xff]  ;;  %679 = vst.msk [vmem:[%s938_s18 + $0x38] sm:$0xff] %vm155_vm0, %v826_v55  ;;  %v447_v61 = vpop.xlane.xlu1 %446 }
  0xca   : > { %v828_v59 = vpop.eup %827  ;;  %v620_v60 = vadd.f32 1.0, %v588_v57  ;;  %557 = vst.msk [vmem:[%s938_s18 + $0x80] sm:$0xff] %vm155_vm0, %v524_v53  ;;  %837 = vrsqrt.f32 %v621_v56  ;;  %v527_v62 = vadd.f32 %v447_v61, %v207_v54  ;;  %v216_v54 = vld [vmem:[%s938_s18 + $0xe0] sm:$0xff] }
  0xcb   : > { %678 = vst.msk [vmem:[%s938_s18 + $0x30] sm:$0xff] %vm155_vm0, %v828_v59  ;;  %v442_v63 = vpop.xlane.xlu0 %441  ;;  %v591_v0 = vld [vmem:[%s938_s18 + $0x78] sm:$0xff] }
  0xcc   : > { %839 = vrsqrt.f32 %v620_v60  ;;  %v526_v1 = vadd.f32 %v442_v63, %v206_v58  ;;  %v830_v3 = vpop.eup %829  ;;  %v623_v4 = vadd.f32 1.0, %v591_v0  ;;  %560 = vst.msk [vmem:[%s938_s18 + $0x98] sm:$0xff] %vm155_vm0, %v527_v62  ;;  %v219_v62 = vld [vmem:[%s938_s18 + $0xf8] sm:$0xff] }
  0xcd   : > { %v590_v5 = vld [vmem:[%s938_s18 + $0x70] sm:$0xff]  ;;  %681 = vst.msk [vmem:[%s938_s18 + $0x48] sm:$0xff] %vm155_vm0, %v830_v3  ;;  %v457_v9 = vpop.xlane.xlu1 %456 }
  0xce   : > { %v832_v7 = vpop.eup %831  ;;  %v622_v8 = vadd.f32 1.0, %v590_v5  ;;  %559 = vst.msk [vmem:[%s938_s18 + $0x90] sm:$0xff] %vm155_vm0, %v526_v1  ;;  %841 = vrsqrt.f32 %v623_v4  ;;  %v529_v10 = vadd.f32 %v457_v9, %v209_v2  ;;  %v218_v2 = vld [vmem:[%s938_s18 + $0xf0] sm:$0xff] }
  0xcf   : > { %680 = vst.msk [vmem:[%s938_s18 + $0x40] sm:$0xff] %vm155_vm0, %v832_v7  ;;  %v452_v11 = vpop.xlane.xlu0 %451  ;;  %v593_v12 = vld [vmem:[%s938_s18 + $0x88] sm:$0xff] }
  0xd0   : > { %843 = vrsqrt.f32 %v622_v8  ;;  %v528_v13 = vadd.f32 %v452_v11, %v208_v6  ;;  %v834_v15 = vpop.eup %833  ;;  %v625_v16 = vadd.f32 1.0, %v593_v12  ;;  %562 = vst.msk [vmem:[%s938_s18 + $0xa8] sm:$0xff] %vm155_vm0, %v529_v10 }
  0xd1   : > { %v592_v17 = vld [vmem:[%s938_s18 + $0x80] sm:$0xff]  ;;  %683 = vst.msk [vmem:[%s938_s18 + $0x58] sm:$0xff] %vm155_vm0, %v834_v15  ;;  %v467_v21 = vpop.xlane.xlu1 %466 }
  0xd2   : > { %v836_v19 = vpop.eup %835  ;;  %v624_v20 = vadd.f32 1.0, %v592_v17  ;;  %561 = vst.msk [vmem:[%s938_s18 + $0xa0] sm:$0xff] %vm155_vm0, %v528_v13  ;;  %845 = vrsqrt.f32 %v625_v16  ;;  %v531_v22 = vadd.f32 %v467_v21, %v211_v14 }
  0xd3   : > { %682 = vst.msk [vmem:[%s938_s18 + $0x50] sm:$0xff] %vm155_vm0, %v836_v19  ;;  %v462_v23 = vpop.xlane.xlu0 %461  ;;  %v595_v24 = vld [vmem:[%s938_s18 + $0x98] sm:$0xff] }
  0xd4   : > { %847 = vrsqrt.f32 %v624_v20  ;;  %v530_v25 = vadd.f32 %v462_v23, %v210_v18  ;;  %v838_v27 = vpop.eup %837  ;;  %v627_v28 = vadd.f32 1.0, %v595_v24  ;;  %564 = vst.msk [vmem:[%s938_s18 + $0xb8] sm:$0xff] %vm155_vm0, %v531_v22 }
  0xd5   : > { %v594_v29 = vld [vmem:[%s938_s18 + $0x90] sm:$0xff]  ;;  %685 = vst.msk [vmem:[%s938_s18 + $0x68] sm:$0xff] %vm155_vm0, %v838_v27  ;;  %v477_v33 = vpop.xlane.xlu1 %476 }
  0xd6   : > { %v840_v31 = vpop.eup %839  ;;  %v626_v32 = vadd.f32 1.0, %v594_v29  ;;  %563 = vst.msk [vmem:[%s938_s18 + $0xb0] sm:$0xff] %vm155_vm0, %v530_v25  ;;  %849 = vrsqrt.f32 %v627_v28  ;;  %v533_v34 = vadd.f32 %v477_v33, %v213_v26 }
  0xd7   : > { %684 = vst.msk [vmem:[%s938_s18 + $0x60] sm:$0xff] %vm155_vm0, %v840_v31  ;;  %v472_v35 = vpop.xlane.xlu0 %471  ;;  %v597_v36 = vld [vmem:[%s938_s18 + $0xa8] sm:$0xff] }
  0xd8   : > { %851 = vrsqrt.f32 %v626_v32  ;;  %v532_v37 = vadd.f32 %v472_v35, %v212_v30  ;;  %v842_v39 = vpop.eup %841  ;;  %v629_v40 = vadd.f32 1.0, %v597_v36  ;;  %566 = vst.msk [vmem:[%s938_s18 + $0xc8] sm:$0xff] %vm155_vm0, %v533_v34 }
  0xd9   : > { %v596_v41 = vld [vmem:[%s938_s18 + $0xa0] sm:$0xff]  ;;  %687 = vst.msk [vmem:[%s938_s18 + $0x78] sm:$0xff] %vm155_vm0, %v842_v39  ;;  %v487_v45 = vpop.xlane.xlu1 %486 }
  0xda   : > { %v844_v43 = vpop.eup %843  ;;  %v628_v44 = vadd.f32 1.0, %v596_v41  ;;  %565 = vst.msk [vmem:[%s938_s18 + $0xc0] sm:$0xff] %vm155_vm0, %v532_v37  ;;  %853 = vrsqrt.f32 %v629_v40  ;;  %v535_v46 = vadd.f32 %v487_v45, %v215_v38 }
  0xdb   : > { %686 = vst.msk [vmem:[%s938_s18 + $0x70] sm:$0xff] %vm155_vm0, %v844_v43  ;;  %v482_v47 = vpop.xlane.xlu0 %481  ;;  %v599_v48 = vld [vmem:[%s938_s18 + $0xb8] sm:$0xff] }
  0xdc   : > { %855 = vrsqrt.f32 %v628_v44  ;;  %v534_v49 = vadd.f32 %v482_v47, %v214_v42  ;;  %v846_v51 = vpop.eup %845  ;;  %v631_v52 = vadd.f32 1.0, %v599_v48  ;;  %568 = vst.msk [vmem:[%s938_s18 + $0xd8] sm:$0xff] %vm155_vm0, %v535_v46 }
  0xdd   : > { %v598_v53 = vld [vmem:[%s938_s18 + $0xb0] sm:$0xff]  ;;  %689 = vst.msk [vmem:[%s938_s18 + $0x88] sm:$0xff] %vm155_vm0, %v846_v51  ;;  %v497_v57 = vpop.xlane.xlu1 %496 }
  0xde   : > { %v848_v55 = vpop.eup %847  ;;  %v630_v56 = vadd.f32 1.0, %v598_v53  ;;  %567 = vst.msk [vmem:[%s938_s18 + $0xd0] sm:$0xff] %vm155_vm0, %v534_v49  ;;  %857 = vrsqrt.f32 %v631_v52  ;;  %v537_v58 = vadd.f32 %v497_v57, %v217_v50 }
  0xdf   : > { %688 = vst.msk [vmem:[%s938_s18 + $0x80] sm:$0xff] %vm155_vm0, %v848_v55  ;;  %v492_v59 = vpop.xlane.xlu0 %491  ;;  %v601_v60 = vld [vmem:[%s938_s18 + $0xc8] sm:$0xff] }
  0xe0   : > { %859 = vrsqrt.f32 %v630_v56  ;;  %v536_v61 = vadd.f32 %v492_v59, %v216_v54  ;;  %v850_v63 = vpop.eup %849  ;;  %v633_v0 = vadd.f32 1.0, %v601_v60  ;;  %570 = vst.msk [vmem:[%s938_s18 + $0xe8] sm:$0xff] %vm155_vm0, %v537_v58 }
  0xe1   : > { %v600_v1 = vld [vmem:[%s938_s18 + $0xc0] sm:$0xff]  ;;  %691 = vst.msk [vmem:[%s938_s18 + $0x98] sm:$0xff] %vm155_vm0, %v850_v63  ;;  %v507_v5 = vpop.xlane.xlu1 %506 }
  0xe2   : > { %v852_v3 = vpop.eup %851  ;;  %v632_v4 = vadd.f32 1.0, %v600_v1  ;;  %569 = vst.msk [vmem:[%s938_s18 + $0xe0] sm:$0xff] %vm155_vm0, %v536_v61  ;;  %861 = vrsqrt.f32 %v633_v0  ;;  %v539_v6 = vadd.f32 %v507_v5, %v219_v62 }
  0xe3   : > { %690 = vst.msk [vmem:[%s938_s18 + $0x90] sm:$0xff] %vm155_vm0, %v852_v3  ;;  %v502_v7 = vpop.xlane.xlu0 %501  ;;  %v603_v8 = vld [vmem:[%s938_s18 + $0xd8] sm:$0xff] }
  0xe4   : > { %863 = vrsqrt.f32 %v632_v4  ;;  %v538_v9 = vadd.f32 %v502_v7, %v218_v2  ;;  %v854_v10 = vpop.eup %853  ;;  %v635_v11 = vadd.f32 1.0, %v603_v8  ;;  %572 = vst.msk [vmem:[%s938_s18 + $0xf8] sm:$0xff] %vm155_vm0, %v539_v6 }
  0xe5   : > { %v602_v12 = vld [vmem:[%s938_s18 + $0xd0] sm:$0xff]  ;;  %693 = vst.msk [vmem:[%s938_s18 + $0xa8] sm:$0xff] %vm155_vm0, %v854_v10 }
  0xe6   : > { %v856_v13 = vpop.eup %855  ;;  %v634_v14 = vadd.f32 1.0, %v602_v12  ;;  %571 = vst.msk [vmem:[%s938_s18 + $0xf0] sm:$0xff] %vm155_vm0, %v538_v9  ;;  %865 = vrsqrt.f32 %v635_v11 }
  0xe7   : > { %692 = vst.msk [vmem:[%s938_s18 + $0xa0] sm:$0xff] %vm155_vm0, %v856_v13  ;;  %v605_v15 = vld [vmem:[%s938_s18 + $0xe8] sm:$0xff] }
  0xe8   : > { %867 = vrsqrt.f32 %v634_v14  ;;  %v858_v16 = vpop.eup %857  ;;  %v637_v17 = vadd.f32 1.0, %v605_v15 }
  0xe9   : > { %v604_v18 = vld [vmem:[%s938_s18 + $0xe0] sm:$0xff]  ;;  %695 = vst.msk [vmem:[%s938_s18 + $0xb8] sm:$0xff] %vm155_vm0, %v858_v16 }
  0xea   : > { %v860_v19 = vpop.eup %859  ;;  %v636_v20 = vadd.f32 1.0, %v604_v18  ;;  %869 = vrsqrt.f32 %v637_v17 }
  0xeb   : > { %694 = vst.msk [vmem:[%s938_s18 + $0xb0] sm:$0xff] %vm155_vm0, %v860_v19  ;;  %v607_v21 = vld [vmem:[%s938_s18 + $0xf8] sm:$0xff] }
  0xec   : > { %871 = vrsqrt.f32 %v636_v20  ;;  %v862_v22 = vpop.eup %861  ;;  %v639_v23 = vadd.f32 1.0, %v607_v21 }
  0xed   : > { %v606_v24 = vld [vmem:[%s938_s18 + $0xf0] sm:$0xff]  ;;  %697 = vst.msk [vmem:[%s938_s18 + $0xc8] sm:$0xff] %vm155_vm0, %v862_v22 }
  0xee   : > { %v864_v25 = vpop.eup %863  ;;  %v638_v26 = vadd.f32 1.0, %v606_v24  ;;  %873 = vrsqrt.f32 %v639_v23 }
  0xef   : > { %696 = vst.msk [vmem:[%s938_s18 + $0xc0] sm:$0xff] %vm155_vm0, %v864_v25 }
  0xf0   : > { %875 = vrsqrt.f32 %v638_v26  ;;  %v866_v27 = vpop.eup %865 }
  0xf1   : > { %699 = vst.msk [vmem:[%s938_s18 + $0xd8] sm:$0xff] %vm155_vm0, %v866_v27 }
  0xf2   : > { %v868_v28 = vpop.eup %867 }
  0xf3   : > { %698 = vst.msk [vmem:[%s938_s18 + $0xd0] sm:$0xff] %vm155_vm0, %v868_v28 }
  0xf4   : > { %v870_v29 = vpop.eup %869 }
  0xf5   : > { %701 = vst.msk [vmem:[%s938_s18 + $0xe8] sm:$0xff] %vm155_vm0, %v870_v29 }
  0xf6   : > { %v872_v30 = vpop.eup %871 }
  0xf7   : > { %700 = vst.msk [vmem:[%s938_s18 + $0xe0] sm:$0xff] %vm155_vm0, %v872_v30 }
  0xf8   : > { %v874_v31 = vpop.eup %873 }
  0xf9   : > { %703 = vst.msk [vmem:[%s938_s18 + $0xf8] sm:$0xff] %vm155_vm0, %v874_v31 }
  0xfa   : > { %v876_v32 = vpop.eup %875 }
  0xfb   : > { %702 = vst.msk [vmem:[%s938_s18 + $0xf0] sm:$0xff] %vm155_vm0, %v876_v32 }
  0xfc PF: > { %s11_s8 = sadd.s32 1, %s899_s8   ;;  %s1335_s6 = smov %s895_s7 }
  0xfd   : > { %p8_p5 = scmp.ge.s32.totalorder %s11_s8, 4   ;;  %s1336_s7 = smov %s1338_s9 }
  0xff   :  { %10 = sbr.rel (!%p8_p5) target bundleno = 2 (0x2), region = 62 }

</bundles_post_ra>
